<compile_context>
chip_gen: v7x
topology: tpu7x:2x2x1
jax: 0.10.0
libtpu: 0.0.40
codegen_flags: <defaults>
</compile_context>

<pallas_src>
import jax
import jax.numpy as jnp
import numpy as np
from jax.experimental import pallas as pl
from jax.experimental.pallas import tpu as pltpu

N_WHILE_ITERS = 1                        # finite truncation of the infinite `while True`
_TARGET_BLOCK_BYTES = 2 * 1024 * 1024    # ~2 MiB per x block; safe on v5e/v6e/v7x defaults
_SMALL_B_UNROLL = 16                     # use VPU broadcast-adds when b <= this


def _round_up(n, m):
    return ((n + m - 1) // m) * m


def _make_transform(b, n_iters=N_WHILE_ITERS):
    """Fold the (truncated) while/for loop into one (b, b) linear map.

    X = X + X[:, idx:idx+1, :]  is  X <- A_idx @ X  with  A_idx = I + e_idx^T
    added into column idx, so the loop nest is M = prod(A_idx) over the
    statically known condition `c % (idx + 1)`.  Entries are small integers
    (exact in f32 for the truncated loop).
    """
    m = np.eye(b, dtype=np.float64)
    c = 1
    for _ in range(n_iters):
        for idx in range(b):
            if c % (idx + 1):
                a = np.eye(b, dtype=np.float64)
                a[:, idx] += 1.0
                m = a @ m
        c *= 3
    return m.astype(np.float32)


def _apply_transform_kernel(m_ref, x_ref, o_ref):
    m = m_ref[...]                        # (b, b) f32, resident across grid steps
    x = x_ref[...]                        # (b, tile)
    b = x.shape[0]
    if b <= _SMALL_B_UNROLL:
        # out[i, :] = sum_j m[i, j] * x[j, :] as unrolled VPU broadcast
        # multiply-adds: no alignment constraints, no sub-tile MXU matmul.
        acc = m[:, 0:1] * x[0:1, :]
        for j in range(1, b):
            acc = acc + m[:, j:j + 1] * x[j:j + 1, :]
    else:
        acc = jnp.dot(m, x, preferred_element_type=jnp.float32)
    o_ref[...] = acc.astype(o_ref.dtype)


@jax.jit
def model_forward(x):
    """Forward for x of shape (..., a, b, d); b (= axis -2) is the sliced axis."""
    b = x.shape[-2]
    m = jnp.asarray(_make_transform(b))            # (b, b) trace-time constant

    # ---- layout plumbing (wrapper side) ------------------------------------
    # Move the contracted axis b to the front and flatten everything else onto
    # a lane-dense last axis; pad lanes only to a multiple of 128 (only when
    # needed).  No sublane padding of the b rows.
    x_m = jnp.moveaxis(x, -2, 0)                   # (b, ...)
    rest_shape = x_m.shape[1:]
    k = int(np.prod(rest_shape)) if rest_shape else 1
    x2d = x_m.reshape(b, k)

    kp = _round_up(k, 128)
    if kp != k:
        x2d = jnp.pad(x2d, ((0, 0), (0, kp - k)))

    # Lane tile sized by bytes: large enough to amortize per-grid-step
    # overhead, small enough that double-buffered in+out fits default scoped
    # VMEM on every TPU generation (v5e 16 MiB, v6e/v7x 32 MiB).
    itemsize = jnp.dtype(x.dtype).itemsize
    lanes_cap = max(128, (_TARGET_BLOCK_BYTES // (b * itemsize)) // 128 * 128)
    tile = min(kp, lanes_cap)
    n_blocks = pl.cdiv(kp, tile)                   # partial last block is fine

    out2d = pl.pallas_call(
        _apply_transform_kernel,
        out_shape=jax.ShapeDtypeStruct((b, kp), x.dtype),
        grid_spec=pltpu.PrefetchScalarGridSpec(
            num_scalar_prefetch=0,
            grid=(n_blocks,),
            in_specs=[
                pl.BlockSpec((b, b), lambda i: (0, 0)),      # M: resident across steps
                pl.BlockSpec((b, tile), lambda i: (0, i)),   # X: lane tiles
            ],
            out_specs=pl.BlockSpec((b, tile), lambda i: (0, i)),
        ),
        compiler_params=pltpu.CompilerParams(
            dimension_semantics=(
                ("parallel",) if n_blocks > 1 else ("arbitrary",)),
        ),
        input_output_aliases={1: 0},               # reuse x2d's HBM buffer
    )(m, x2d)

    out = out2d[:, :k].reshape((b,) + rest_shape)
    return jnp.moveaxis(out, 0, -2)


def _reference_forward(x):
    # Pure-JAX reference mirroring the (truncated) PyTorch loop, for checking.
    X = x
    b = X.shape[1]
    c = 1
    for _ in range(N_WHILE_ITERS):
        for idx in range(b):
            if c % (idx + 1):
                X = X + X[:, idx:idx + 1, :]
        c *= 3
    return X


if __name__ == "__main__":
    # Single instance, same shape as the PyTorch script: x1 = torch.randn(3, 5, 2)
    x1 = jax.random.normal(jax.random.PRNGKey(0), (3, 5, 2), dtype=jnp.float32)
    out = jax.block_until_ready(model_forward(x1))
    ref = _reference_forward(x1)
    assert out.shape == ref.shape and out.dtype == ref.dtype
    assert jnp.allclose(out, ref, atol=1e-4, rtol=1e-4)

    # Batched throughput path: many instances behind one lane-dense, single
    # grid-step block (k = 3072 lanes, already 128-aligned -> no padding).
    xb = jax.random.normal(jax.random.PRNGKey(1), (512, 3, 5, 2), dtype=jnp.float32)
    outb = jax.block_until_ready(model_forward(xb))
    refb = jax.vmap(_reference_forward)(xb)
    assert outb.shape == refb.shape and outb.dtype == refb.dtype
    assert jnp.allclose(outb, refb, atol=1e-4, rtol=1e-4)

    print("KERNEL_OK")
</pallas_src>

<mosaic_0001>
module attributes {stable_mosaic.version = 11 : i64} {
  func.func @_apply_transform_kernel(%arg0: i32, %arg1: memref<5x5xf32, #tpu.memory_space<vmem>>, %arg2: memref<5x128xf32, #tpu.memory_space<vmem>>, %arg3: memref<5x128xf32, #tpu.memory_space<vmem>>) attributes {dimension_semantics = [#tpu.dimension_semantics<arbitrary>], iteration_bounds = array<i64: 1>, scalar_prefetch = 0 : i64, scratch_operands = 0 : i64, tpu.core_type = #tpu.core_type<tc>, window_params = [{pipeline_mode = #tpu.pipeline_mode<synchronous>, transform_indices = @transform_0, window_bounds = array<i64: 5, 5>}, {transform_indices = @transform_1, window_bounds = array<i64: 5, 128>}, {transform_indices = @transform_2, window_bounds = array<i64: 5, 128>}]} {
    %c0 = arith.constant 0 : index
    %c0_0 = arith.constant 0 : index
    %0 = vector.load %arg1[%c0, %c0_0] : memref<5x5xf32, #tpu.memory_space<vmem>>, vector<5x5xf32>
    %c0_1 = arith.constant 0 : index
    %c0_2 = arith.constant 0 : index
    %1 = vector.load %arg2[%c0_1, %c0_2] : memref<5x128xf32, #tpu.memory_space<vmem>>, vector<5x128xf32>
    %2 = vector.extract_strided_slice %0 {offsets = [0, 0], sizes = [5, 1], strides = [1, 1]} : vector<5x5xf32> to vector<5x1xf32>
    %3 = vector.extract_strided_slice %1 {offsets = [0, 0], sizes = [1, 128], strides = [1, 1]} : vector<5x128xf32> to vector<1x128xf32>
    %4 = vector.broadcast %2 : vector<5x1xf32> to vector<5x128xf32>
    %5 = vector.broadcast %3 : vector<1x128xf32> to vector<5x128xf32>
    %6 = arith.mulf %4, %5 : vector<5x128xf32>
    %7 = vector.extract_strided_slice %0 {offsets = [0, 1], sizes = [5, 1], strides = [1, 1]} : vector<5x5xf32> to vector<5x1xf32>
    %8 = vector.extract_strided_slice %1 {offsets = [1, 0], sizes = [1, 128], strides = [1, 1]} : vector<5x128xf32> to vector<1x128xf32>
    %9 = vector.broadcast %7 : vector<5x1xf32> to vector<5x128xf32>
    %10 = vector.broadcast %8 : vector<1x128xf32> to vector<5x128xf32>
    %11 = arith.mulf %9, %10 : vector<5x128xf32>
    %12 = arith.addf %6, %11 : vector<5x128xf32>
    %13 = vector.extract_strided_slice %0 {offsets = [0, 2], sizes = [5, 1], strides = [1, 1]} : vector<5x5xf32> to vector<5x1xf32>
    %14 = vector.extract_strided_slice %1 {offsets = [2, 0], sizes = [1, 128], strides = [1, 1]} : vector<5x128xf32> to vector<1x128xf32>
    %15 = vector.broadcast %13 : vector<5x1xf32> to vector<5x128xf32>
    %16 = vector.broadcast %14 : vector<1x128xf32> to vector<5x128xf32>
    %17 = arith.mulf %15, %16 : vector<5x128xf32>
    %18 = arith.addf %12, %17 : vector<5x128xf32>
    %19 = vector.extract_strided_slice %0 {offsets = [0, 3], sizes = [5, 1], strides = [1, 1]} : vector<5x5xf32> to vector<5x1xf32>
    %20 = vector.extract_strided_slice %1 {offsets = [3, 0], sizes = [1, 128], strides = [1, 1]} : vector<5x128xf32> to vector<1x128xf32>
    %21 = vector.broadcast %19 : vector<5x1xf32> to vector<5x128xf32>
    %22 = vector.broadcast %20 : vector<1x128xf32> to vector<5x128xf32>
    %23 = arith.mulf %21, %22 : vector<5x128xf32>
    %24 = arith.addf %18, %23 : vector<5x128xf32>
    %25 = vector.extract_strided_slice %0 {offsets = [0, 4], sizes = [5, 1], strides = [1, 1]} : vector<5x5xf32> to vector<5x1xf32>
    %26 = vector.extract_strided_slice %1 {offsets = [4, 0], sizes = [1, 128], strides = [1, 1]} : vector<5x128xf32> to vector<1x128xf32>
    %27 = vector.broadcast %25 : vector<5x1xf32> to vector<5x128xf32>
    %28 = vector.broadcast %26 : vector<1x128xf32> to vector<5x128xf32>
    %29 = arith.mulf %27, %28 : vector<5x128xf32>
    %30 = arith.addf %24, %29 : vector<5x128xf32>
    %c0_3 = arith.constant 0 : index
    %c0_4 = arith.constant 0 : index
    %31 = vector.load %arg3[%c0_3, %c0_4] : memref<5x128xf32, #tpu.memory_space<vmem>>, vector<5x128xf32>
    tpu.vector_store %arg3[%c0_3, %c0_4], %30 {strides = array<i32>} : memref<5x128xf32, #tpu.memory_space<vmem>>, vector<5x128xf32>,
    return
  }
  func.func @transform_0(%arg0: i32) -> (i32, i32) {
    %c0_i32 = arith.constant 0 : i32
    %c0_i32_0 = arith.constant 0 : i32
    %c0_i32_1 = arith.constant 0 : i32
    return %c0_i32, %c0_i32_0 : i32, i32
  }
  func.func @transform_1(%arg0: i32) -> (i32, i32) {
    %c0_i32 = arith.constant 0 : i32
    %c0_i32_0 = arith.constant 0 : i32
    return %c0_i32, %arg0 : i32, i32
  }
  func.func @transform_2(%arg0: i32) -> (i32, i32) {
    %c0_i32 = arith.constant 0 : i32
    %c0_i32_0 = arith.constant 0 : i32
    return %c0_i32, %arg0 : i32, i32
  }
}

</mosaic_0001>

<bundles_post_ra>
// kernel: model_forward.1
= control target key start
LH: loop header
LB: loop body
LE: loop exit
PB: predicated region body
PF: predicated region fallthrough
CT: control target
= control target key end

     0   :  { %v79_v0 = vmov 0   ;;  %v80_v1 = vmov 2   ;;  %v81_v3 = vmov 1   ;;  %v82_v4 = vmov 3   ;;  %s108_s0 = inlined_call_operand.vmem [shape: f32[5,5], index: 0, kind: input, shape index: {}]   ;;  %s109_s1 = inlined_call_operand.vmem [shape: f32[5,128], index: 1, kind: input, shape index: {}, may-alias: {1,2}]   ;;  %s110_s2 = inlined_call_operand.vmem [shape: f32[5,128], index: 2, kind: output, shape index: {}, may-alias: {1,2}]  }
   0x1   :  { %73 = vset.pattern.permute.xlu0 %v79_v0  ;;  %75 = vset.pattern.permute.xlu1 %v80_v1  ;;  %v11_v2 = vld [vmem:[%s108_s0] sm:$0x1f]  ;;  %v83_v5 = vmov 4   ;;  %v18_v6 = vlaneseq }
   0x2   :  { %15 = vperm.xlu0 %73, %v11_v2   ;;  %34 = vperm.xlu1 %75, %v11_v2   ;;  %v12_v10 = vld [vmem:[%s109_s1] sm:$0x1f] }
   0x3   :  { %v19_v7 = vshrl.u32 %v18_v6, 7 }
   0x5   :  { %v20_v8 = vsub.s32 0, %v19_v7  ;;  %v29_v9 = vsub.s32 1, %v19_v7  ;;  %v39_v12 = vsub.s32 2, %v19_v7  ;;  %v49_v16 = vsub.s32 3, %v19_v7 }
   0x6   :  { %74 = vset.pattern.permute.xlu0 %v81_v3  ;;  %76 = vset.pattern.permute.xlu1 %v82_v4  ;;  %v59_v17 = vsub.s32 4, %v19_v7 }
   0x7   :  { %24 = vperm.xlu0 %74, %v11_v2   ;;  %44 = vperm.xlu1 %76, %v11_v2   ;;  %v21_v14 = vrot.slane %v12_v10, %v20_v8  ;;  %v30_v15 = vrot.slane %v12_v10, %v29_v9  ;;  %v40_v18 = vrot.slane %v12_v10, %v39_v12 }
   0x8   :  { %v50_v23 = vrot.slane %v12_v10, %v49_v16  ;;  %v60_v24 = vrot.slane %v12_v10, %v59_v17 }
   0xb   :  { %77 = vset.pattern.permute.xlu1 %v83_v5  ;;  %78 = vset.pattern.permute.xlu0 %v83_v5 }
   0xc   :  { %54 = vperm.xlu1 %77, %v11_v2  }
  0x81   :  { %v16_v11 = vpop.permute.xlu0 %15  ;;  %v35_v13 = vpop.permute.xlu1 %34 }
  0x82   :  { %v22_v21 = vmul.f32 %v21_v14, %v16_v11  ;;  %v41_v25 = vmul.f32 %v40_v18, %v35_v13 }
  0x86   :  { %v25_v19 = vpop.permute.xlu0 %24  ;;  %v45_v20 = vpop.permute.xlu1 %44 }
  0x87   :  { %v31_v22 = vmul.f32 %v30_v15, %v25_v19  ;;  %v51_v28 = vmul.f32 %v50_v23, %v45_v20 }
  0x89   :  { %v32_v26 = vadd.f32 %v31_v22, %v22_v21 }
  0x8b   :  { %v42_v27 = vadd.f32 %v41_v25, %v32_v26  ;;  %v55_v29 = vpop.permute.xlu1 %54 }
  0x8c   :  { %v61_v30 = vmul.f32 %v60_v24, %v55_v29 }
  0x8d   :  { %v52_v31 = vadd.f32 %v51_v28, %v42_v27 }
  0x8f   :  { %v62_v32 = vadd.f32 %v61_v30, %v52_v31 }
  0x91   :  { %63 = vst [vmem:[%s110_s2] sm:$0x1f] %v62_v32 }

</bundles_post_ra>
